<compile_context>
chip_gen: v6e
topology: v6e:2x2x1
jax: 0.10.0
libtpu: 0.0.40
codegen_flags: <defaults>
</compile_context>

<pallas_src>
import functools

import jax
import jax.numpy as jnp
from jax.experimental import pallas as pl
from jax.experimental.pallas import tpu as pltpu


def _round_up(x, m):
    return ((x + m - 1) // m) * m


def _class_tiling(num_classes, tile_n):
    """Pick (tn, Cp) consistently for param prep and the forward call."""
    c_aligned = _round_up(num_classes, 128)
    tn = min(tile_n, c_aligned)
    cp = _round_up(num_classes, tn)
    # Prefer >= 2 class tiles so the 'parallel' j axis can shard across
    # v7x's two TensorCores (only when it stays lane-aligned).
    if cp // tn < 2 and cp >= 256 and (cp // 2) % 128 == 0:
        tn = cp // 2
    return tn, cp


# ----------------------------------------------------------------------------- kernels
def _linear_bias_kernel(x_ref, w_ref, b_ref, o_ref):
    # Whole input_dim as a single K block: one MXU matmul + bias, no scratch.
    o_ref[...] = (
        jnp.dot(x_ref[...], w_ref[...], preferred_element_type=jnp.float32)
        + b_ref[...]
    )


def _linear_bias_ktiled_kernel(x_ref, w_ref, b_ref, o_ref):
    # Fallback for very large input_dim: accumulate directly into the resident
    # f32 output block (its index map ignores k), so no VMEM scratch is needed.
    k = pl.program_id(2)

    @pl.when(k == 0)
    def _():
        o_ref[...] = jnp.broadcast_to(b_ref[...], o_ref.shape)

    o_ref[...] += jnp.dot(x_ref[...], w_ref[...],
                          preferred_element_type=jnp.float32)


# ----------------------------------------------------------------------------- forward
@functools.partial(jax.jit, static_argnames=("num_classes", "tile_n"))
def multiclass_attribute_head_fwd(x, wp, bp, *, num_classes, tile_n=512):
    """logits = x @ W + b.

    `wp`  : pre-padded, pre-cast (bf16) weight of shape (Dp, Cp), Dp/Cp lane-aligned.
    `bp`  : pre-padded f32 bias of shape (1, Cp).
    """
    B, D = x.shape
    Dp, Cp = wp.shape
    tn, cp_check = _class_tiling(num_classes, tile_n)
    assert cp_check == Cp, "wp/bp were padded with a different tile_n"

    # Batch tiling: exact 8-aligned tile for small/medium batches (no waste),
    # 128-row tiles for large batches.
    tm = _round_up(B, 8) if B <= 256 else 128
    Bp = _round_up(B, tm)

    xp = x
    if (Bp, Dp) != (B, D):
        xp = jnp.pad(x, ((0, Bp - B), (0, Dp - D)))
    xp = xp.astype(wp.dtype)  # bf16 operands, f32 accumulate in-kernel

    # Pick the K block: whole Dp if the double-buffered working set fits a
    # conservative budget (safe on v5e/v6e/v7x); otherwise halve until it does.
    itm = wp.dtype.itemsize

    def vmem_bytes(tk):
        ins = 2 * (tm * tk + tk * tn) * itm          # double-buffered x, W tiles
        outs = 2 * tm * tn * 4 + 2 * tn * 4          # output + bias blocks
        return ins + outs

    vmem_budget = 24 * 1024 * 1024
    tk = Dp
    while vmem_bytes(tk) > vmem_budget and tk % 2 == 0 and (tk // 2) % 128 == 0:
        tk //= 2

    cost = pl.CostEstimate(
        flops=2 * Bp * Dp * Cp,
        transcendentals=0,
        bytes_accessed=(xp.size * itm + wp.size * itm + Bp * Cp * 4 + Cp * 4),
    )
    cparams_kwargs = dict(vmem_limit_bytes=48 * 1024 * 1024)

    if tk == Dp:
        out_p = pl.pallas_call(
            _linear_bias_kernel,
            out_shape=jax.ShapeDtypeStruct((Bp, Cp), jnp.float32),
            grid_spec=pltpu.PrefetchScalarGridSpec(
                num_scalar_prefetch=0,
                grid=(Bp // tm, Cp // tn),
                in_specs=[
                    pl.BlockSpec((tm, Dp), lambda i, j: (i, 0)),   # x tile
                    pl.BlockSpec((Dp, tn), lambda i, j: (0, j)),   # W tile
                    pl.BlockSpec((1, tn), lambda i, j: (0, j)),    # bias tile
                ],
                out_specs=pl.BlockSpec((tm, tn), lambda i, j: (i, j)),
            ),
            compiler_params=pltpu.CompilerParams(
                dimension_semantics=("parallel", "parallel"), **cparams_kwargs),
            cost_estimate=cost,
        )(xp, wp, bp)
    else:
        out_p = pl.pallas_call(
            _linear_bias_ktiled_kernel,
            out_shape=jax.ShapeDtypeStruct((Bp, Cp), jnp.float32),
            grid_spec=pltpu.PrefetchScalarGridSpec(
                num_scalar_prefetch=0,
                grid=(Bp // tm, Cp // tn, Dp // tk),               # reduction last
                in_specs=[
                    pl.BlockSpec((tm, tk), lambda i, j, k: (i, k)),
                    pl.BlockSpec((tk, tn), lambda i, j, k: (k, j)),
                    pl.BlockSpec((1, tn), lambda i, j, k: (0, j)),
                ],
                out_specs=pl.BlockSpec((tm, tn), lambda i, j, k: (i, j)),
            ),
            compiler_params=pltpu.CompilerParams(
                dimension_semantics=("parallel", "parallel", "arbitrary"),
                **cparams_kwargs),
            cost_estimate=cost,
        )(xp, wp, bp)

    return out_p[:B, :num_classes]


# ----------------------------------------------------------------------------- module
class MultiClassAttributeHead:
    """Pallas-TPU port of the PyTorch module (a single nn.Linear)."""

    def __init__(self, key, input_dim, num_classes, *, tile_n=512,
                 param_dtype=jnp.bfloat16):
        k1, k2 = jax.random.split(key)
        bound = 1.0 / float(input_dim) ** 0.5
        # Stored transposed vs. torch's (out, in) so the kernel is a plain x @ W.
        w = jax.random.uniform(k1, (input_dim, num_classes), jnp.float32,
                               -bound, bound)
        b = jax.random.uniform(k2, (num_classes,), jnp.float32, -bound, bound)

        self.input_dim = int(input_dim)
        self.num_classes = int(num_classes)
        self.tile_n = int(tile_n)
        self.w = w  # f32 master copies (reference / checkpoint)
        self.b = b

        # One-time pad + cast, hoisted out of the per-call hot path.
        tn, Cp = _class_tiling(self.num_classes, self.tile_n)
        Dp = _round_up(self.input_dim, 128)
        self.wp = jnp.pad(
            w, ((0, Dp - self.input_dim), (0, Cp - self.num_classes))
        ).astype(param_dtype)
        self.bp = jnp.pad(
            jnp.reshape(b, (1, -1)).astype(jnp.float32),
            ((0, 0), (0, Cp - self.num_classes)),
        )

    def __call__(self, x):
        return multiclass_attribute_head_fwd(
            x, self.wp, self.bp,
            num_classes=self.num_classes, tile_n=self.tile_n)


def reference_f32(x, w, b):
    return x @ w + b


def reference_bf16(x, w, b):
    return (jnp.dot(x.astype(jnp.bfloat16), w.astype(jnp.bfloat16),
                    preferred_element_type=jnp.float32) + b)


if __name__ == "__main__":
    key = jax.random.PRNGKey(0)

    # Small shapes consistent with MultiClassAttributeHead(input_dim, num_classes).
    configs = [
        (2, 64, 16),     # tiny sanity config
        (4, 256, 384),   # exercises multi class-tile path
    ]
    for (B, INPUT_DIM, NUM_CLASSES) in configs:
        key, kx, kp = jax.random.split(key, 3)
        x = jax.random.normal(kx, (B, INPUT_DIM), jnp.float32)
        head = MultiClassAttributeHead(kp, INPUT_DIM, NUM_CLASSES)

        logits = jax.block_until_ready(head(x))
        assert logits.shape == (B, NUM_CLASSES)

        ref_bf = reference_bf16(x, head.w, head.b)
        ref_fp = reference_f32(x, head.w, head.b)
        # Tight check vs. bf16-operand reference (same numerics as the kernel).
        assert jnp.allclose(logits, ref_bf, atol=1e-3, rtol=1e-3), (
            f"bf16-ref max abs err {jnp.max(jnp.abs(logits - ref_bf))}")
        # Loose check vs. the pure-f32 nn.Linear reference.
        assert jnp.allclose(logits, ref_fp, atol=5e-2, rtol=5e-2), (
            f"f32-ref max abs err {jnp.max(jnp.abs(logits - ref_fp))}")

    print("KERNEL_OK")
</pallas_src>

<mosaic_0001>
module attributes {stable_mosaic.version = 11 : i64} {
  func.func @_linear_bias_kernel(%arg0: i32, %arg1: i32, %arg2: memref<8x128xbf16, #tpu.memory_space<vmem>>, %arg3: memref<128x128xbf16, #tpu.memory_space<vmem>>, %arg4: memref<1x128xf32, #tpu.memory_space<vmem>>, %arg5: memref<8x128xf32, #tpu.memory_space<vmem>>) attributes {dimension_semantics = [#tpu.dimension_semantics<parallel>, #tpu.dimension_semantics<parallel>], iteration_bounds = array<i64: 1, 1>, scalar_prefetch = 0 : i64, scratch_operands = 0 : i64, tpu.core_type = #tpu.core_type<tc>, window_params = [{transform_indices = @transform_0, window_bounds = array<i64: 8, 128>}, {transform_indices = @transform_1, window_bounds = array<i64: 128, 128>}, {transform_indices = @transform_2, window_bounds = array<i64: 1, 128>}, {transform_indices = @transform_3, window_bounds = array<i64: 8, 128>}]} {
    %c0 = arith.constant 0 : index
    %c0_0 = arith.constant 0 : index
    %0 = vector.load %arg2[%c0, %c0_0] : memref<8x128xbf16, #tpu.memory_space<vmem>>, vector<8x128xbf16>
    %c0_1 = arith.constant 0 : index
    %c0_2 = arith.constant 0 : index
    %1 = vector.load %arg3[%c0_1, %c0_2] : memref<128x128xbf16, #tpu.memory_space<vmem>>, vector<128x128xbf16>
    %cst = arith.constant dense<0.000000e+00> : vector<8x128xf32>
    %2 = tpu.matmul %0, %1, %cst {dimension_numbers = #tpu.dot_dimension_numbers<[1], [0], [0], [1], [0, 0, 1, 1], [], []>} : vector<8x128xbf16>, vector<128x128xbf16>, vector<8x128xf32> -> vector<8x128xf32>
    %c0_3 = arith.constant 0 : index
    %c0_4 = arith.constant 0 : index
    %3 = vector.load %arg4[%c0_3, %c0_4] : memref<1x128xf32, #tpu.memory_space<vmem>>, vector<1x128xf32>
    %4 = vector.broadcast %3 : vector<1x128xf32> to vector<8x128xf32>
    %5 = arith.addf %2, %4 : vector<8x128xf32>
    %c0_5 = arith.constant 0 : index
    %c0_6 = arith.constant 0 : index
    %6 = vector.load %arg5[%c0_5, %c0_6] : memref<8x128xf32, #tpu.memory_space<vmem>>, vector<8x128xf32>
    tpu.vector_store %arg5[%c0_5, %c0_6], %5 {strides = array<i32>} : memref<8x128xf32, #tpu.memory_space<vmem>>, vector<8x128xf32>,
    return
  }
  func.func @transform_0(%arg0: i32, %arg1: i32) -> (i32, i32) {
    %c0_i32 = arith.constant 0 : i32
    %c0_i32_0 = arith.constant 0 : i32
    return %arg0, %c0_i32 : i32, i32
  }
  func.func @transform_1(%arg0: i32, %arg1: i32) -> (i32, i32) {
    %c0_i32 = arith.constant 0 : i32
    %c0_i32_0 = arith.constant 0 : i32
    return %c0_i32, %arg1 : i32, i32
  }
  func.func @transform_2(%arg0: i32, %arg1: i32) -> (i32, i32) {
    %c0_i32 = arith.constant 0 : i32
    %c0_i32_0 = arith.constant 0 : i32
    return %c0_i32, %arg1 : i32, i32
  }
  func.func @transform_3(%arg0: i32, %arg1: i32) -> (i32, i32) {
    %c0_i32 = arith.constant 0 : i32
    return %arg0, %arg1 : i32, i32
  }
}

</mosaic_0001>

<bundles_post_ra>
// kernel: multiclass_attribute_head_fwd.1
= control target key start
LH: loop header
LB: loop body
LE: loop exit
PB: predicated region body
PF: predicated region fallthrough
CT: control target
= control target key end

     0   :  { %8 = vsyncpa [#allocation3], 0  ;;  %s220_s12 = smov [#allocation2]   ;;  %s257_s0 = inlined_call_operand.vmem [shape: bf16[8,128], index: 0, kind: input, shape index: {}]   ;;  %s258_s1 = inlined_call_operand.hbm [shape: bf16[128,128], index: 1, kind: input, shape index: {}]   ;;  %s259_s2 = inlined_call_operand.vmem [shape: f32[1,128], index: 2, kind: input, shape index: {}]   ;;  %s260_s3 = inlined_call_operand.vmem [shape: f32[8,128], index: 3, kind: output, shape index: {}]  }
   0x1   :  { %s16_s13 = sshll.u32 %s220_s12, 4  ;;  %s17_s13 = int_to_ptr.vmem [resolvable:$true] %s16_s13 }
   0x2   :  { %s206_s14 = scalar_lea.vmem %s17_s13, 1024  ;;  %p211_p1 = scmp.lt.s32.totalorder %s17_s13, %s17_s13 }
   0x3   :  { %p207_p0 = scmp.ne.s32.totalorder %s17_s13, %s206_s14  ;;  %p212_p2 = scmp.lt.s32.totalorder %s206_s14, %s206_s14 }
   0x5   :  { %p213_p3 = por %p212_p2, %p211_p1 }
   0x7   :  { %p214_p4 = pnand %p213_p3, %p207_p0 }
   0x9   :  { %217 = shalt.err (!%p214_p4)
}
   0xa   :  { %s221_s15 = smov 64   ;;  %s222_s16 = smov 4  }
   0xb   :  { %22 = dma.hbm_to_vmem [thread:$0]  %s258_s1, 1024, %s17_s13, [#allocation3], %s221_s15, %s221_s15, %s222_s16  }
   0xc   :  { %218 = dma.done.wait [#allocation3], 1024  }
   0xd   :  { %219 = vsyncadd [#allocation3], 4294966272  ;;  %v223_v0 = vmov 0.0   ;;  %vm224_vm0 = vmmov 0   ;;  %v190_v1 = vld [vmem:[#allocation2 + $0x38] sm:$0xff]   ;;  %v191_v2 = vld [vmem:[#allocation2 + $0x30] sm:$0xff]  }
   0xe   :  { %165 = vmatprep.subr.bf16.mxu0 %v223_v0  ;;  %181 = vmatprep.mubr.msk.bf16.mxu0 %vm224_vm0, %v223_v0  ;;  %v192_v3 = vld [vmem:[#allocation2 + $0x28] sm:$0xff]   ;;  %v193_v4 = vld [vmem:[#allocation2 + $0x20] sm:$0xff]   ;;  %v194_v5 = vld [vmem:[#allocation2 + $0x18] sm:$0xff]  }
   0xf   :  { %166 = vmatpush3.bf16.msra.mxu0 %v190_v1  ;;  %v195_v6 = vld [vmem:[#allocation2 + $0x10] sm:$0xff]   ;;  %v196_v7 = vld [vmem:[#allocation2 + $0x8] sm:$0xff]   ;;  %v197_v8 = vld [vmem:[#allocation2] sm:$0xff]  }
  0x10   :  { %167 = vmatprep.subr.bf16.mxu0 %v223_v0  ;;  %v29_v9 = vld [vmem:[%s257_s0] sm:$0xf] }
  0x11   :  { %v147_v10 = vld [vmem:[%s259_s2] ss:$0 sm:$0xff] }
  0x13   :  { %168 = vmatpush3.bf16.msra.mxu0 %v191_v2 }
  0x14   :  { %169 = vmatprep.subr.bf16.mxu0 %v223_v0 }
  0x17   :  { %170 = vmatpush3.bf16.msra.mxu0 %v192_v3 }
  0x18   :  { %171 = vmatprep.subr.bf16.mxu0 %v223_v0 }
  0x1b   :  { %172 = vmatpush3.bf16.msra.mxu0 %v193_v4 }
  0x1c   :  { %173 = vmatprep.subr.bf16.mxu0 %v223_v0 }
  0x1f   :  { %174 = vmatpush3.bf16.msra.mxu0 %v194_v5 }
  0x20   :  { %175 = vmatprep.subr.bf16.mxu0 %v223_v0 }
  0x23   :  { %176 = vmatpush3.bf16.msra.mxu0 %v195_v6 }
  0x24   :  { %177 = vmatprep.subr.bf16.mxu0 %v223_v0 }
  0x27   :  { %178 = vmatpush3.bf16.msra.mxu0 %v196_v7 }
  0x28   :  { %179 = vmatprep.subr.bf16.mxu0 %v223_v0 }
  0x2b   :  { %180 = vmatpush3.bf16.msra.mxu0 %v197_v8 }
  0x2e   :  { %182 = vmatmul.mubr.bf16.vlgmr.msra.gmra.mxu0 %v29_v9 }
  0xee   :  { %v135_v11 = vpop.f32.mrf.mxu0 }
  0xef   :  { %v136_v12 = vadd.f32 %v147_v10, %v135_v11 }
  0xf0   :  { %v183_v13 = vpop.f32.mrf.mxu0 }
  0xf1   :  { %141 = vst [vmem:[%s260_s3] sm:$0xff] %v136_v12 }
  0xf2   :  { %v138_v14 = vpop.f32.mrf.mxu0 }
  0xf4   :  { %v184_v15 = vpop.f32.mrf.mxu0 }
  0xf5   :  { %146 = vsyncpa [#allocation3], 1 }

</bundles_post_ra>
